<compile_context>
chip_gen: v6e
topology: v6e:2x2x1
jax: 0.10.0
libtpu: 0.0.40
codegen_flags: <defaults>
</compile_context>

<pallas_src>
import jax
import jax.numpy as jnp
from jax.experimental import pallas as pl
from jax.experimental.pallas import tpu as pltpu


_LANE = 128
_SUBLANE = 8
_VMEM_LIMIT_BYTES = 48 * 1024 * 1024    # safe on v7x (64 MiB/TC) and v5e/v6e (128 MiB)
_TILE_BUDGET_BYTES = 28 * 1024 * 1024   # streamed tiles + in-kernel scratch
_FOLD_K_MAX = 16 * 1024                 # fold mean into W1 while repeat(W1, L) stays <= 4 MiB


def _round_up(n, m):
    return ((n + m - 1) // m) * m


def _pad2(a, rows, cols, dtype):
    out = jnp.zeros((rows, cols), dtype)
    return out.at[: a.shape[0], : a.shape[1]].set(a.astype(dtype))


def _mlp_kernel(x_ref, w1_ref, b1_ref, w2_ref, b2_ref, w3_ref, b3_ref, o_ref):
    x = x_ref[...]                        # f32, streamed straight from HBM
    if x.ndim == 3:                       # (TB, C, L): 1/L folded into W1 -> plain sum here
        x = jnp.sum(x, axis=2)            # f32 accumulate, no full-tile cast
    # bf16 MXU inputs, f32 accumulation; bias + ReLU in f32.
    h1 = jnp.dot(x.astype(jnp.bfloat16), w1_ref[...],
                 preferred_element_type=jnp.float32)
    h1 = jnp.maximum(h1 + b1_ref[...], 0.0)
    h2 = jnp.dot(h1.astype(jnp.bfloat16), w2_ref[...],
                 preferred_element_type=jnp.float32)
    h2 = jnp.maximum(h2 + b2_ref[...], 0.0)
    out = jnp.dot(h2.astype(jnp.bfloat16), w3_ref[...],
                  preferred_element_type=jnp.float32)
    o_ref[...] = out + b3_ref[...]        # lane-dense unmasked store


def _pick_tile_b(batch, per_row_bytes, resident_bytes):
    """Largest batch tile (multiple of 8) that fits the VMEM budget, with >=2
    grid steps when the batch allows (v7x megacore) and minimal padding."""
    budget = max(_TILE_BUDGET_BYTES - resident_bytes, 2 * 1024 * 1024)
    cap = max(_SUBLANE, (budget // per_row_bytes) // _SUBLANE * _SUBLANE)
    b8 = _round_up(batch, _SUBLANE)
    tb = min(cap, b8)
    nsteps = pl.cdiv(b8, tb)
    if batch > _SUBLANE and nsteps < 2:
        nsteps = 2                        # give both v7x TensorCores a grid step
    # Redistribute so padding stays at most ~1 sublane-row per step.
    tb = min(_round_up(pl.cdiv(b8, nsteps), _SUBLANE), b8)
    return tb


def learning_module_forward(x, params):
    """x: (B, in_channels, L) float32.  Returns (B, num_classes) float32."""
    w1, b1, w2, b2, w3, b3 = params
    B, C, L = x.shape
    H1, H2, NC = w1.shape[1], w2.shape[1], w3.shape[1]
    K = C * L

    h1p = _round_up(H1, _LANE)
    h2p = _round_up(H2, _LANE)
    ncp = _round_up(max(NC, _LANE), _LANE)

    # Fold mean(axis=2) into the first Linear:  x.reshape(B, C*L) @ repeat(W1/L, L, axis=0).
    fold = K <= _FOLD_K_MAX
    w1s = w1.astype(jnp.float32) * (1.0 / L)        # 1/L mean scale folded into W1
    if fold:
        w1s = jnp.repeat(w1s, L, axis=0)            # (C*L, H1): row c*L+l <- W1[c]/L
    w1p = _pad2(w1s, w1s.shape[0], h1p, jnp.bfloat16)
    b1p = _pad2(b1.reshape(1, -1), 1, h1p, jnp.float32)
    w2p = _pad2(w2, h1p, h2p, jnp.bfloat16)
    b2p = _pad2(b2.reshape(1, -1), 1, h2p, jnp.float32)
    w3p = _pad2(w3, h2p, ncp, jnp.bfloat16)
    b3p = _pad2(b3.reshape(1, -1), 1, ncp, jnp.float32)

    if fold:
        x_op = x.reshape(B, K)                      # free reshape of the native layout
        k_lane = _round_up(K, _LANE)
        # double-buffered f32 x tile (+ lane pad) + its in-kernel bf16 copy, per row
        stream_row = 2 * k_lane * 4 + k_lane * 2
    else:
        x_op = x
        stream_row = 2 * _round_up(C, _SUBLANE) * _round_up(L, _LANE) * 4

    per_row = stream_row + 2 * ncp * 4 + (h1p + h2p + ncp) * 6   # out dbl-buf + intermediates
    resident = 2 * (w1p.size + w2p.size + w3p.size) + 4 * (b1p.size + b2p.size + b3p.size)
    tb = _pick_tile_b(B, per_row, resident)

    grid = pl.cdiv(B, tb)
    b_out = grid * tb                               # output covers the grid exactly

    if fold:
        x_spec = pl.BlockSpec((tb, K), lambda i: (i, 0))
    else:
        x_spec = pl.BlockSpec((tb, C, L), lambda i: (i, 0, 0))
    const = lambda i: (0, 0)

    out = pl.pallas_call(
        _mlp_kernel,
        out_shape=jax.ShapeDtypeStruct((b_out, ncp), jnp.float32),
        grid_spec=pltpu.PrefetchScalarGridSpec(
            num_scalar_prefetch=0,
            grid=(grid,),
            in_specs=[
                x_spec,                             # streamed + double-buffered
                pl.BlockSpec(w1p.shape, const),     # weights/biases: VMEM-resident
                pl.BlockSpec(b1p.shape, const),
                pl.BlockSpec(w2p.shape, const),
                pl.BlockSpec(b2p.shape, const),
                pl.BlockSpec(w3p.shape, const),
                pl.BlockSpec(b3p.shape, const),
            ],
            out_specs=pl.BlockSpec((tb, ncp), lambda i: (i, 0)),
        ),
        compiler_params=pltpu.CompilerParams(
            dimension_semantics=("parallel",),      # shards batch steps over v7x's 2 TCs
            vmem_limit_bytes=_VMEM_LIMIT_BYTES,
        ),
    )(x_op, w1p, b1p, w2p, b2p, w3p, b3p)

    return out[:B, :NC]


def init_params(key, in_channels, num_classes):
    """Deterministic init mimicking torch.nn.Linear defaults (U(-1/sqrt(fan_in), +))."""
    dims = [(in_channels, 128), (128, 64), (64, num_classes)]
    params = []
    for fan_in, fan_out in dims:
        kw, kb, key = jax.random.split(key, 3)
        bound = 1.0 / jnp.sqrt(fan_in)
        w = jax.random.uniform(kw, (fan_in, fan_out), jnp.float32, -bound, bound)
        b = jax.random.uniform(kb, (fan_out,), jnp.float32, -bound, bound)
        params.extend([w, b])
    return tuple(params)


if __name__ == "__main__":
    B, in_channels, L, num_classes = 2, 32, 8, 10

    key = jax.random.PRNGKey(0)
    kx, kp = jax.random.split(key)
    x = jax.random.normal(kx, (B, in_channels, L), dtype=jnp.float32)
    params = init_params(kp, in_channels, num_classes)

    out = learning_module_forward(x, params)
    jax.block_until_ready(out)

    # Plain-JAX f32 reference (original PyTorch semantics).
    w1, b1, w2, b2, w3, b3 = params

    def ref_fwd(xin):
        xm = xin.mean(axis=2)
        h = jnp.maximum(xm @ w1 + b1, 0.0)
        h = jnp.maximum(h @ w2 + b2, 0.0)
        return h @ w3 + b3

    ref = ref_fwd(x)

    assert out.shape == (B, num_classes)
    max_err = float(jnp.max(jnp.abs(out - ref)))
    # bf16 MXU inputs (weights + in-kernel activation cast) with f32 accumulation
    # -> bf16-level tolerance against the pure-f32 reference.
    assert jnp.allclose(out, ref, atol=3e-2, rtol=3e-2), max_err

    print("KERNEL_OK")
</pallas_src>

<mosaic_0001>
module attributes {stable_mosaic.version = 11 : i64} {
  func.func @_mlp_kernel(%arg0: i32, %arg1: memref<8x256xf32, #tpu.memory_space<vmem>>, %arg2: memref<256x128xbf16, #tpu.memory_space<vmem>>, %arg3: memref<1x128xf32, #tpu.memory_space<vmem>>, %arg4: memref<128x128xbf16, #tpu.memory_space<vmem>>, %arg5: memref<1x128xf32, #tpu.memory_space<vmem>>, %arg6: memref<128x128xbf16, #tpu.memory_space<vmem>>, %arg7: memref<1x128xf32, #tpu.memory_space<vmem>>, %arg8: memref<8x128xf32, #tpu.memory_space<vmem>>) attributes {dimension_semantics = [#tpu.dimension_semantics<parallel>], iteration_bounds = array<i64: 1>, scalar_prefetch = 0 : i64, scratch_operands = 0 : i64, tpu.core_type = #tpu.core_type<tc>, window_params = [{transform_indices = @transform_0, window_bounds = array<i64: 8, 256>}, {pipeline_mode = #tpu.pipeline_mode<synchronous>, transform_indices = @transform_1, window_bounds = array<i64: 256, 128>}, {pipeline_mode = #tpu.pipeline_mode<synchronous>, transform_indices = @transform_2, window_bounds = array<i64: 1, 128>}, {pipeline_mode = #tpu.pipeline_mode<synchronous>, transform_indices = @transform_3, window_bounds = array<i64: 128, 128>}, {pipeline_mode = #tpu.pipeline_mode<synchronous>, transform_indices = @transform_4, window_bounds = array<i64: 1, 128>}, {pipeline_mode = #tpu.pipeline_mode<synchronous>, transform_indices = @transform_5, window_bounds = array<i64: 128, 128>}, {pipeline_mode = #tpu.pipeline_mode<synchronous>, transform_indices = @transform_6, window_bounds = array<i64: 1, 128>}, {transform_indices = @transform_7, window_bounds = array<i64: 8, 128>}]} {
    %c0 = arith.constant 0 : index
    %c0_0 = arith.constant 0 : index
    %0 = vector.load %arg1[%c0, %c0_0] : memref<8x256xf32, #tpu.memory_space<vmem>>, vector<8x256xf32>
    %1 = arith.truncf %0 : vector<8x256xf32> to vector<8x256xbf16>
    %c0_1 = arith.constant 0 : index
    %c0_2 = arith.constant 0 : index
    %2 = vector.load %arg2[%c0_1, %c0_2] : memref<256x128xbf16, #tpu.memory_space<vmem>>, vector<256x128xbf16>
    %cst = arith.constant dense<0.000000e+00> : vector<8x128xf32>
    %3 = tpu.matmul %1, %2, %cst {dimension_numbers = #tpu.dot_dimension_numbers<[1], [0], [0], [1], [0, 0, 1, 1], [], []>} : vector<8x256xbf16>, vector<256x128xbf16>, vector<8x128xf32> -> vector<8x128xf32>
    %c0_3 = arith.constant 0 : index
    %c0_4 = arith.constant 0 : index
    %4 = vector.load %arg3[%c0_3, %c0_4] : memref<1x128xf32, #tpu.memory_space<vmem>>, vector<1x128xf32>
    %5 = vector.broadcast %4 : vector<1x128xf32> to vector<8x128xf32>
    %6 = arith.addf %3, %5 : vector<8x128xf32>
    %cst_5 = arith.constant 0.000000e+00 : f32
    %7 = vector.broadcast %cst_5 : f32 to vector<8x128xf32>
    %8 = arith.maximumf %6, %7 : vector<8x128xf32>
    %9 = arith.truncf %8 : vector<8x128xf32> to vector<8x128xbf16>
    %c0_6 = arith.constant 0 : index
    %c0_7 = arith.constant 0 : index
    %10 = vector.load %arg4[%c0_6, %c0_7] : memref<128x128xbf16, #tpu.memory_space<vmem>>, vector<128x128xbf16>
    %cst_8 = arith.constant dense<0.000000e+00> : vector<8x128xf32>
    %11 = tpu.matmul %9, %10, %cst_8 {dimension_numbers = #tpu.dot_dimension_numbers<[1], [0], [0], [1], [0, 0, 1, 1], [], []>} : vector<8x128xbf16>, vector<128x128xbf16>, vector<8x128xf32> -> vector<8x128xf32>
    %c0_9 = arith.constant 0 : index
    %c0_10 = arith.constant 0 : index
    %12 = vector.load %arg5[%c0_9, %c0_10] : memref<1x128xf32, #tpu.memory_space<vmem>>, vector<1x128xf32>
    %13 = vector.broadcast %12 : vector<1x128xf32> to vector<8x128xf32>
    %14 = arith.addf %11, %13 : vector<8x128xf32>
    %cst_11 = arith.constant 0.000000e+00 : f32
    %15 = vector.broadcast %cst_11 : f32 to vector<8x128xf32>
    %16 = arith.maximumf %14, %15 : vector<8x128xf32>
    %17 = arith.truncf %16 : vector<8x128xf32> to vector<8x128xbf16>
    %c0_12 = arith.constant 0 : index
    %c0_13 = arith.constant 0 : index
    %18 = vector.load %arg6[%c0_12, %c0_13] : memref<128x128xbf16, #tpu.memory_space<vmem>>, vector<128x128xbf16>
    %cst_14 = arith.constant dense<0.000000e+00> : vector<8x128xf32>
    %19 = tpu.matmul %17, %18, %cst_14 {dimension_numbers = #tpu.dot_dimension_numbers<[1], [0], [0], [1], [0, 0, 1, 1], [], []>} : vector<8x128xbf16>, vector<128x128xbf16>, vector<8x128xf32> -> vector<8x128xf32>
    %c0_15 = arith.constant 0 : index
    %c0_16 = arith.constant 0 : index
    %20 = vector.load %arg7[%c0_15, %c0_16] : memref<1x128xf32, #tpu.memory_space<vmem>>, vector<1x128xf32>
    %21 = vector.broadcast %20 : vector<1x128xf32> to vector<8x128xf32>
    %22 = arith.addf %19, %21 : vector<8x128xf32>
    %c0_17 = arith.constant 0 : index
    %c0_18 = arith.constant 0 : index
    %23 = vector.load %arg8[%c0_17, %c0_18] : memref<8x128xf32, #tpu.memory_space<vmem>>, vector<8x128xf32>
    tpu.vector_store %arg8[%c0_17, %c0_18], %22 {strides = array<i32>} : memref<8x128xf32, #tpu.memory_space<vmem>>, vector<8x128xf32>,
    return
  }
  func.func @transform_0(%arg0: i32) -> (i32, i32) {
    %c0_i32 = arith.constant 0 : i32
    %c0_i32_0 = arith.constant 0 : i32
    return %arg0, %c0_i32 : i32, i32
  }
  func.func @transform_1(%arg0: i32) -> (i32, i32) {
    %c0_i32 = arith.constant 0 : i32
    %c0_i32_0 = arith.constant 0 : i32
    %c0_i32_1 = arith.constant 0 : i32
    return %c0_i32, %c0_i32_0 : i32, i32
  }
  func.func @transform_2(%arg0: i32) -> (i32, i32) {
    %c0_i32 = arith.constant 0 : i32
    %c0_i32_0 = arith.constant 0 : i32
    %c0_i32_1 = arith.constant 0 : i32
    return %c0_i32, %c0_i32_0 : i32, i32
  }
  func.func @transform_3(%arg0: i32) -> (i32, i32) {
    %c0_i32 = arith.constant 0 : i32
    %c0_i32_0 = arith.constant 0 : i32
    %c0_i32_1 = arith.constant 0 : i32
    return %c0_i32, %c0_i32_0 : i32, i32
  }
  func.func @transform_4(%arg0: i32) -> (i32, i32) {
    %c0_i32 = arith.constant 0 : i32
    %c0_i32_0 = arith.constant 0 : i32
    %c0_i32_1 = arith.constant 0 : i32
    return %c0_i32, %c0_i32_0 : i32, i32
  }
  func.func @transform_5(%arg0: i32) -> (i32, i32) {
    %c0_i32 = arith.constant 0 : i32
    %c0_i32_0 = arith.constant 0 : i32
    %c0_i32_1 = arith.constant 0 : i32
    return %c0_i32, %c0_i32_0 : i32, i32
  }
  func.func @transform_6(%arg0: i32) -> (i32, i32) {
    %c0_i32 = arith.constant 0 : i32
    %c0_i32_0 = arith.constant 0 : i32
    %c0_i32_1 = arith.constant 0 : i32
    return %c0_i32, %c0_i32_0 : i32, i32
  }
  func.func @transform_7(%arg0: i32) -> (i32, i32) {
    %c0_i32 = arith.constant 0 : i32
    %c0_i32_0 = arith.constant 0 : i32
    return %arg0, %c0_i32 : i32, i32
  }
}

</mosaic_0001>

<bundles_post_ra>
// kernel: tpu_custom_call.1
= control target key start
LH: loop header
LB: loop body
LE: loop exit
PB: predicated region body
PF: predicated region fallthrough
CT: control target
= control target key end

     0   :  { %12 = vsyncpa [#allocation3], 0  ;;  %s904_s0 = inlined_call_operand.hbm [shape: f32[2,256], index: 0, kind: input, shape index: {}]   ;;  %s905_s1 = inlined_call_operand.hbm [shape: bf16[256,128], index: 1, kind: input, shape index: {}]   ;;  %s906_s2 = inlined_call_operand.vmem [shape: f32[1,128], index: 2, kind: input, shape index: {}]   ;;  %s907_s3 = inlined_call_operand.hbm [shape: bf16[128,128], index: 3, kind: input, shape index: {}]   ;;  %s908_s4 = inlined_call_operand.vmem [shape: f32[1,128], index: 4, kind: input, shape index: {}]   ;;  %s909_s5 = inlined_call_operand.hbm [shape: bf16[128,128], index: 5, kind: input, shape index: {}]   ;;  %s910_s6 = inlined_call_operand.vmem [shape: f32[1,128], index: 6, kind: input, shape index: {}]   ;;  %s911_s7 = inlined_call_operand.hbm [shape: f32[8,128], index: 7, kind: output, shape index: {}]  }
   0x1   :  { %13 = vsyncpa [#allocation6], 0 }
   0x2   :  { %14 = vsyncpa [#allocation9], 0 }
   0x3   :  { %15 = vsyncpa [#allocation4], 0 }
   0x4   :  { %20 = vsyncadd [#allocation3], 192  ;;  %s801_s24 = smov [#allocation5]   ;;  %s802_s26 = smov [#allocation2]  }
   0x5   :  { %s33_s25 = sshll.u32 %s801_s24, 4  ;;  %s21_s27 = sshll.u32 %s802_s26, 4  ;;  %s34_s25 = int_to_ptr.vmem [resolvable:$true] %s33_s25  ;;  %s22_s27 = int_to_ptr.vmem [resolvable:$true] %s21_s27 }
   0x6   :  { %s701_s28 = scalar_lea.vmem %s34_s25, 2048  ;;  %p706_p1 = scmp.lt.s32.totalorder %s34_s25, %s34_s25 }
   0x7   :  { %p702_p0 = scmp.ne.s32.totalorder %s34_s25, %s701_s28  ;;  %p707_p2 = scmp.lt.s32.totalorder %s701_s28, %s701_s28 }
   0x9   :  { %p708_p3 = por %p707_p2, %p706_p1 }
   0xb   :  { %p709_p4 = pnand %p708_p3, %p702_p0 }
   0xd   :  { %712 = shalt.err (!%p709_p4)
}
   0xe   :  { %s803_s29 = smov 64   ;;  %s804_s30 = smov 4  }
   0xf   :  { %39 = dma.hbm_to_vmem [thread:$0]  %s905_s1, 2048, %s34_s25, [#allocation6], %s803_s29, %s803_s29, %s804_s30  }
  0x10   :  { %s721_s10 = scalar_lea.vmem %s22_s27, 64  ;;  %s725_s11 = scalar_lea.vmem %s22_s27, 256 }
  0x11   :  { %p722_p5 = scmp.ne.s32.totalorder %s22_s27, %s721_s10  ;;  %p726_p6 = scmp.lt.s32.totalorder %s22_s27, %s22_s27 }
  0x12   :  { %p727_p7 = scmp.lt.s32.totalorder %s725_s11, %s721_s10 }
  0x14   :  { %p728_p8 = por %p727_p7, %p726_p6 }
  0x16   :  { %p729_p9 = pnand %p728_p8, %p722_p5 }
  0x18   :  { %732 = shalt.err (!%p729_p9)
}
  0x19   :  { %27 = dma.hbm_to_vmem [thread:$0]  %s904_s0, 64, %s22_s27, [#allocation3], %s803_s29, %s803_s29, %s804_s30  }
  0x1a   :  { %s805_s14 = smov [#allocation7]   ;;  %s806_s16 = smov [#allocation8]  }
  0x1b   :  { %s47_s15 = sshll.u32 %s805_s14, 4  ;;  %s61_s17 = sshll.u32 %s806_s16, 4  ;;  %s48_s15 = int_to_ptr.vmem [resolvable:$true] %s47_s15  ;;  %s62_s17 = int_to_ptr.vmem [resolvable:$true] %s61_s17 }
  0x1c   :  { %s741_s1 = scalar_lea.vmem %s48_s15, 1024  ;;  %p746_p11 = scmp.lt.s32.totalorder %s48_s15, %s48_s15 }
  0x1d   :  { %p742_p10 = scmp.ne.s32.totalorder %s48_s15, %s741_s1  ;;  %p747_p12 = scmp.lt.s32.totalorder %s741_s1, %s741_s1 }
  0x1f   :  { %p748_p13 = por %p747_p12, %p746_p11 }
  0x21   :  { %p749_p0 = pnand %p748_p13, %p742_p10 }
  0x23   :  { %752 = shalt.err (!%p749_p0)
}
  0x24   :  { %53 = dma.hbm_to_vmem [thread:$0]  %s907_s3, 1024, %s48_s15, [#allocation6], %s803_s29, %s803_s29, %s804_s30  }
  0x25   :  { %s761_s0 = scalar_lea.vmem %s62_s17, 1024  ;;  %p766_p2 = scmp.lt.s32.totalorder %s62_s17, %s62_s17 }
  0x26   :  { %p762_p1 = scmp.ne.s32.totalorder %s62_s17, %s761_s0  ;;  %p767_p3 = scmp.lt.s32.totalorder %s761_s0, %s761_s0 }
  0x28   :  { %p768_p4 = por %p767_p3, %p766_p2 }
  0x2a   :  { %p769_p5 = pnand %p768_p4, %p762_p1 }
  0x2c   :  { %772 = shalt.err (!%p769_p5)
}
  0x2d   :  { %67 = dma.hbm_to_vmem [thread:$0]  %s909_s5, 1024, %s62_s17, [#allocation9], %s803_s29, %s803_s29, %s804_s30  }
  0x2e   :  { %793 = dma.done.wait [#allocation3], 256  }
  0x2f   :  { %794 = vsyncadd [#allocation3], 4294967040 }
  0x30   :  { %795 = dma.done.wait [#allocation6], 3072  }
  0x31   :  { %796 = vsyncadd [#allocation6], 4294964224 }
  0x32   :  { %797 = dma.done.wait [#allocation9], 1024  }
  0x33   :  { %798 = vsyncadd [#allocation9], 4294966272  ;;  %v807_v0 = vmov 0.0   ;;  %v657_v1 = vld [vmem:[#allocation5 + $0x78] sm:$0xff]   ;;  %v659_v3 = vld [vmem:[#allocation5 + $0x70] sm:$0xff]   ;;  %vm808_vm0 = vmmov 0  }
  0x34   :  { %607 = vmatprep.subr.bf16.mxu1 %v807_v0  ;;  %v658_v2 = vld [vmem:[#allocation5 + $0x38] sm:$0xff]   ;;  %567 = vmatprep.subr.bf16.mxu0 %v657_v1  ;;  %v660_v4 = vld [vmem:[#allocation5 + $0x30] sm:$0xff]   ;;  %v661_v5 = vld [vmem:[#allocation5 + $0x68] sm:$0xff]   ;;  %s809_s25 = smov [#allocation10]  }
  0x35   :  { %568 = vmatpush3.bf16.msra.mxu0 %v658_v2  ;;  %v662_v6 = vld [vmem:[#allocation5 + $0x28] sm:$0xff]   ;;  %v663_v7 = vld [vmem:[#allocation5 + $0x60] sm:$0xff]   ;;  %v665_v9 = vld [vmem:[#allocation5 + $0x58] sm:$0xff]   ;;  %623 = vmatprep.mubr.msk.bf16.mxu1 %vm808_vm0, %v807_v0  ;;  %s521_s26 = sshll.u32 %s809_s25, 4  ;;  %s522_s26 = int_to_ptr.vmem [resolvable:$true] %s521_s26 }
  0x36   :  { %569 = vmatprep.subr.bf16.mxu0 %v659_v3  ;;  %v664_v8 = vld [vmem:[#allocation5 + $0x20] sm:$0xff]   ;;  %v666_v10 = vld [vmem:[#allocation5 + $0x18] sm:$0xff]   ;;  %v667_v11 = vld [vmem:[#allocation5 + $0x50] sm:$0xff]   ;;  %p778_p7 = scmp.lt.s32.totalorder %s522_s26, %s522_s26 }
  0x37   :  { %v668_v12 = vld [vmem:[#allocation5 + $0x10] sm:$0xff]   ;;  %v692_v14 = vld.sshfl [vmem:[#allocation2 + $0x8] sm:$0xff pattern:$0x76325410]  ;;  %v669_v16 = vld [vmem:[#allocation5 + $0x48] sm:$0xff]  }
  0x38   :  { %v691_v13 = vld.sshfl [vmem:[#allocation2] sm:$0xff pattern:$0x76325410]  ;;  %v675_v15 = vld [vmem:[#allocation7 + $0x38] sm:$0xff]   ;;  %v670_v18 = vld [vmem:[#allocation5 + $0x8] sm:$0xff]  }
  0x39   :  { %570 = vmatpush3.bf16.msra.mxu0 %v660_v4  ;;  %608 = vmatpush3.bf16.msra.mxu1 %v675_v15  ;;  %v676_v17 = vld [vmem:[#allocation7 + $0x30] sm:$0xff]   ;;  %v108_v19 = vcombine.high %v691_v13, %v692_v14  ;;  %v671_v20 = vld [vmem:[#allocation5 + $0x40] sm:$0xff]   ;;  %v677_v21 = vld [vmem:[#allocation7 + $0x28] sm:$0xff]   ;;  %v107_v24 = vcombine.low %v691_v13, %v692_v14 }
  0x3a   :  { %571 = vmatprep.subr.bf16.mxu0 %v661_v5  ;;  %609 = vmatprep.subr.bf16.mxu1 %v807_v0  ;;  %v672_v23 = vld [vmem:[#allocation5] sm:$0xff]   ;;  %v679_v27 = vld [vmem:[#allocation7 + $0x18] sm:$0xff]   ;;  %v680_v28 = vld [vmem:[#allocation7 + $0x10] sm:$0xff]  }
  0x3b   :  { %v112_v22 = vpack.c.bf16 %v108_v19, %v108_v19  ;;  %v678_v25 = vld [vmem:[#allocation7 + $0x20] sm:$0xff]   ;;  %v111_v26 = vpack.c.bf16 %v107_v24, %v107_v24  ;;  %v681_v29 = vld [vmem:[#allocation7 + $0x8] sm:$0xff]   ;;  %v683_v31 = vld [vmem:[#allocation8 + $0x38] sm:$0xff]  }
  0x3c   :  { %v682_v30 = vld [vmem:[#allocation7] sm:$0xff]   ;;  %v684_v32 = vld [vmem:[#allocation8 + $0x30] sm:$0xff]   ;;  %v685_v33 = vld [vmem:[#allocation8 + $0x28] sm:$0xff]  }
  0x3d   :  { %572 = vmatpush3.bf16.msra.mxu0 %v662_v6  ;;  %610 = vmatpush3.bf16.msra.mxu1 %v676_v17  ;;  %v686_v34 = vld [vmem:[#allocation8 + $0x20] sm:$0xff]   ;;  %v687_v35 = vld [vmem:[#allocation8 + $0x18] sm:$0xff]   ;;  %v688_v36 = vld [vmem:[#allocation8 + $0x10] sm:$0xff]  }
  0x3e   :  { %573 = vmatprep.subr.bf16.mxu0 %v663_v7  ;;  %280 = vmatprep.mubr.bf16.mxu0 %v112_v22  ;;  %v532_v38 = vld [vmem:[%s906_s2] ss:$0 sm:$0xff]  ;;  %v689_v46 = vld [vmem:[#allocation8 + $0x8] sm:$0xff]   ;;  %v690_v47 = vld [vmem:[#allocation8] sm:$0xff]  }
  0x3f   :  { %611 = vmatprep.subr.bf16.mxu1 %v807_v0  ;;  %v549_v48 = vld [vmem:[%s908_s4] ss:$0 sm:$0xff]  ;;  %s773_s4 = scalar_lea.vmem %s522_s26, 128 }
  0x40   :  { %v558_v56 = vld [vmem:[%s910_s6] ss:$0 sm:$0xff]  ;;  %p774_p6 = scmp.ne.s32.totalorder %s522_s26, %s773_s4  ;;  %p779_p8 = scmp.lt.s32.totalorder %s773_s4, %s773_s4 }
  0x41   :  { %574 = vmatpush3.bf16.msra.mxu0 %v664_v8  ;;  %612 = vmatpush3.bf16.msra.mxu1 %v677_v21 }
  0x42   :  { %575 = vmatprep.subr.bf16.mxu0 %v665_v9  ;;  %613 = vmatprep.subr.bf16.mxu1 %v807_v0  ;;  %p780_p9 = por %p779_p8, %p778_p7 }
  0x44   :  { %p781_p10 = pnand %p780_p9, %p774_p6 }
  0x45   :  { %576 = vmatpush3.bf16.msra.mxu0 %v666_v10  ;;  %614 = vmatpush3.bf16.msra.mxu1 %v678_v25 }
  0x46   :  { %577 = vmatprep.subr.bf16.mxu0 %v667_v11  ;;  %615 = vmatprep.subr.bf16.mxu1 %v807_v0 }
  0x49   :  { %578 = vmatpush3.bf16.msra.mxu0 %v668_v12  ;;  %616 = vmatpush3.bf16.msra.mxu1 %v679_v27 }
  0x4a   :  { %579 = vmatprep.subr.bf16.mxu0 %v669_v16  ;;  %617 = vmatprep.subr.bf16.mxu1 %v807_v0 }
  0x4d   :  { %580 = vmatpush3.bf16.msra.mxu0 %v670_v18  ;;  %618 = vmatpush3.bf16.msra.mxu1 %v680_v28 }
  0x4e   :  { %581 = vmatprep.subr.bf16.mxu0 %v671_v20  ;;  %619 = vmatprep.subr.bf16.mxu1 %v807_v0 }
  0x51   :  { %582 = vmatpush3.bf16.msra.mxu0 %v672_v23  ;;  %620 = vmatpush3.bf16.msra.mxu1 %v681_v29 }
  0x52   :  { %627 = vmatprep.subr.bf16.mxu0 %v807_v0  ;;  %621 = vmatprep.subr.bf16.mxu1 %v807_v0 }
  0x54   :  { %281 = vmatmul.mubr.bf16.vlgmr.msra.gmra.mxu0 %v111_v26 }
  0x55   :  { %622 = vmatpush3.bf16.msra.mxu1 %v682_v30  ;;  %643 = vmatprep.mubr.msk.bf16.mxu0 %vm808_vm0, %v807_v0 }
  0x56   :  { %628 = vmatpush3.bf16.msra.mxu0 %v683_v31 }
  0x57   :  { %629 = vmatprep.subr.bf16.mxu0 %v807_v0 }
  0x5a   :  { %630 = vmatpush3.bf16.msra.mxu0 %v684_v32 }
  0x5b   :  { %631 = vmatprep.subr.bf16.mxu0 %v807_v0 }
  0x5e   :  { %632 = vmatpush3.bf16.msra.mxu0 %v685_v33 }
  0x5f   :  { %633 = vmatprep.subr.bf16.mxu0 %v807_v0 }
  0x62   :  { %634 = vmatpush3.bf16.msra.mxu0 %v686_v34 }
  0x63   :  { %635 = vmatprep.subr.bf16.mxu0 %v807_v0 }
  0x66   :  { %636 = vmatpush3.bf16.msra.mxu0 %v687_v35 }
  0x67   :  { %637 = vmatprep.subr.bf16.mxu0 %v807_v0 }
  0x6a   :  { %638 = vmatpush3.bf16.msra.mxu0 %v688_v36 }
  0x6b   :  { %639 = vmatprep.subr.bf16.mxu0 %v807_v0 }
  0x6e   :  { %640 = vmatpush3.bf16.msra.mxu0 %v689_v46 }
  0x6f   :  { %641 = vmatprep.subr.bf16.mxu0 %v807_v0 }
  0x72   :  { %642 = vmatpush3.bf16.msra.mxu0 %v690_v47 }
 0x114   :  { %v583_v37 = vpop.f32.mrf.mxu0 }
 0x116   :  { %v584_v39 = vpop.f32.mrf.mxu0 }
 0x117   :  { %v585_v40 = vadd.f32 %v584_v39, %v583_v37 }
 0x118   :  { %v586_v41 = vpop.f32.mrf.mxu0 }
 0x119   :  { %v283_v42 = vadd.f32 %v585_v40, %v532_v38 }
 0x11a   :  { %v587_v43 = vpop.f32.mrf.mxu0 }
 0x11b   :  { %v288_v44 = vmax.f32 %v283_v42, 0.0 }
 0x11d   :  { %v289_v45 = vpack.c.bf16 %v288_v44, %v288_v44 }
 0x11f   :  { %624 = vmatmul.mubr.bf16.vlgmr.msra.gmra.mxu1 %v289_v45 }
 0x1df   :  { %v395_v49 = vpop.f32.mrf.mxu1 }
 0x1e0   :  { %v396_v50 = vadd.f32 %v549_v48, %v395_v49 }
 0x1e1   :  { %v625_v51 = vpop.f32.mrf.mxu1 }
 0x1e2   :  { %v401_v52 = vmax.f32 %v396_v50, 0.0 }
 0x1e3   :  { %v398_v53 = vpop.f32.mrf.mxu1 }
 0x1e4   :  { %v402_v54 = vpack.c.bf16 %v401_v52, %v401_v52 }
 0x1e5   :  { %v626_v55 = vpop.f32.mrf.mxu1 }
 0x1e6   :  { %644 = vmatmul.mubr.bf16.vlgmr.msra.gmra.mxu0 %v402_v54 }
 0x2a6   :  { %v508_v57 = vpop.f32.mrf.mxu0 }
 0x2a7   :  { %v509_v58 = vadd.f32 %v558_v56, %v508_v57 }
 0x2a8   :  { %v645_v59 = vpop.f32.mrf.mxu0 }
 0x2a9   :  { %514 = vst [vmem:[#allocation10] sm:$0xff] %v509_v58 }
 0x2aa   :  { %v511_v60 = vpop.f32.mrf.mxu0 }
 0x2ab   :  { %784 = shalt.err (!%p781_p10)
}
 0x2ac   :  { %524 = dma.vmem_to_hbm [thread:$0]  %s522_s26, 128, %s911_s7, [#allocation4]   ;;  %v646_v61 = vpop.f32.mrf.mxu0 }
 0x2ad   :  { %799 = dma.done.wait [#allocation4], 128  }
 0x2ae   :  { %800 = vsyncadd [#allocation4], 4294967168 }
 0x2af   :  { %528 = vsyncpa [#allocation3], 1 }
 0x2b0   :  { %529 = vsyncpa [#allocation6], 1 }
 0x2b1   :  { %530 = vsyncpa [#allocation9], 1 }
 0x2b2   :  { %531 = vsyncpa [#allocation4], 1 }

</bundles_post_ra>
